<compile_context>
chip_gen: v6e
topology: v6e:2x2x1
jax: 0.10.0
libtpu: 0.0.40
codegen_flags: <defaults>
</compile_context>

<pallas_src>
import functools

import jax
import jax.numpy as jnp
from jax.experimental import pallas as pl
from jax.experimental.pallas import tpu as pltpu


def _round_up(x, m):
    return (x + m - 1) // m * m


def critic_mlp_kernel(x_ref, w1_ref, b1_ref, w2_ref, b2_ref,
                      w3_ref, b3_ref, w4_ref, b4_ref, out_ref):
    """Whole 4-layer MLP for one batch tile, entirely in VMEM.

    Layers 1-3 run on the MXU in bf16 with f32 accumulation; the final
    (hidden -> 1) layer is a VPU multiply + XLU lane reduction so the stored
    output is a single f32 column per row.
    """
    x = x_ref[...].astype(jnp.bfloat16)                       # cast in VMEM
    h1 = jnp.maximum(
        jnp.dot(x, w1_ref[...], preferred_element_type=jnp.float32)
        + b1_ref[...], 0.0)                                   # ReLU (f32)
    h2 = jnp.tanh(
        jnp.dot(h1.astype(jnp.bfloat16), w2_ref[...],
                preferred_element_type=jnp.float32)
        + b2_ref[...])                                        # Tanh (f32)
    h3 = jnp.tanh(
        jnp.dot(h2.astype(jnp.bfloat16), w3_ref[...],
                preferred_element_type=jnp.float32)
        + b3_ref[...])                                        # Tanh (f32)
    # Value head: (tb, D3p) * (1, D3p) -> lane reduce -> (tb, 1).
    out_ref[...] = (jnp.sum(h3 * w4_ref[...], axis=-1, keepdims=True)
                    + b4_ref[...])


@functools.partial(jax.jit, static_argnames=("tile_b",))
def critic_forward(obs, params, *, tile_b=512):
    (w1, b1), (w2, b2), (w3, b3), (w4, b4) = params
    B, F = obs.shape
    D1, D2, D3, D4 = w1.shape[1], w2.shape[1], w3.shape[1], w4.shape[1]
    assert D4 == 1, "Critic value head must have a single output"

    D1p = _round_up(D1, 128)
    D2p = _round_up(D2, 128)
    D3p = _round_up(D3, 128)

    obs32 = obs.astype(jnp.float32)
    if B <= tile_b:
        # Tiny batch: single tile; pad by at most 7 rows to a sublane multiple.
        tb = _round_up(B, 8)
        x = obs32 if tb == B else jnp.pad(obs32, ((0, tb - B), (0, 0)))
    else:
        # Large batch: no padding / no extra HBM copy; ragged last tile is
        # handled by Pallas (OOB reads are garbage per-row, OOB writes dropped).
        tb = _round_up(tile_b, 8)
        x = obs32
    Bx = x.shape[0]
    grid = (pl.cdiv(Bx, tb),)

    def pad2(a, rows, cols, dtype):
        a = a.astype(dtype)
        return jnp.pad(a, ((0, rows - a.shape[0]), (0, cols - a.shape[1])))

    # Weights stored [in, out]; matmul weights in bf16, biases / head in f32.
    w1p = pad2(w1, F, D1p, jnp.bfloat16)
    b1p = pad2(b1.reshape(1, -1), 1, D1p, jnp.float32)
    w2p = pad2(w2, D1p, D2p, jnp.bfloat16)
    b2p = pad2(b2.reshape(1, -1), 1, D2p, jnp.float32)
    w3p = pad2(w3, D2p, D3p, jnp.bfloat16)
    b3p = pad2(b3.reshape(1, -1), 1, D3p, jnp.float32)
    w4row = pad2(w4.reshape(1, -1), 1, D3p, jnp.float32)      # (1, D3p)
    b4p = b4.reshape(1, 1).astype(jnp.float32)                # (1, 1)

    full = lambda r, c: pl.BlockSpec((r, c), lambda i: (0, 0))

    cost = pl.CostEstimate(
        flops=2 * B * (F * D1 + D1 * D2 + D2 * D3 + D3 * D4),
        transcendentals=B * (D2 + D3),
        bytes_accessed=(B * F * 4                              # obs (f32 read)
                        + (F * D1 + D1 * D2 + D2 * D3 + D3 * D4) * 2
                        + (D1 + D2 + D3 + D4) * 4
                        + B * D4 * 4),                         # values out
    )

    out = pl.pallas_call(
        critic_mlp_kernel,
        out_shape=jax.ShapeDtypeStruct((Bx, 1), jnp.float32),
        grid_spec=pltpu.PrefetchScalarGridSpec(
            num_scalar_prefetch=0,
            grid=grid,
            in_specs=[
                pl.BlockSpec((tb, F), lambda i: (i, 0)),       # obs tile (f32)
                full(F, D1p), full(1, D1p),                    # layer 1
                full(D1p, D2p), full(1, D2p),                  # layer 2
                full(D2p, D3p), full(1, D3p),                  # layer 3
                full(1, D3p), full(1, 1),                      # value head
            ],
            out_specs=pl.BlockSpec((tb, 1), lambda i: (i, 0)),
        ),
        compiler_params=pltpu.CompilerParams(
            dimension_semantics=("parallel",)),
        cost_estimate=cost,
    )(x, w1p, b1p, w2p, b2p, w3p, b3p, w4row, b4p)

    return out[:B]


def init_linear(key, fan_in, fan_out):
    """Deterministic PyTorch-style init: U(-1/sqrt(fan_in), 1/sqrt(fan_in))."""
    kw, kb = jax.random.split(key)
    bound = 1.0 / jnp.sqrt(jnp.float32(fan_in))
    w = jax.random.uniform(kw, (fan_in, fan_out), jnp.float32, -bound, bound)
    b = jax.random.uniform(kb, (fan_out,), jnp.float32, -bound, bound)
    return w, b


def init_critic_params(key, feature_dim):
    dims = [feature_dim, 180, 151, 127, 1]
    keys = jax.random.split(key, 4)
    return tuple(init_linear(k, dims[i], dims[i + 1])
                 for i, k in enumerate(keys))


def critic_reference(obs, params):
    (w1, b1), (w2, b2), (w3, b3), (w4, b4) = params
    h = jnp.maximum(obs @ w1 + b1, 0.0)
    h = jnp.tanh(h @ w2 + b2)
    h = jnp.tanh(h @ w3 + b3)
    return h @ w4 + b4


if __name__ == "__main__":
    key = jax.random.PRNGKey(0)
    k_params, k_obs = jax.random.split(key)

    feature_dim, action_dim = 16, 4   # action_dim unused by Critic.net
    params = init_critic_params(k_params, feature_dim)

    # batch=2: single small tile; 1024: even multi-tile; 600: ragged last tile.
    for batch in (2, 1024, 600):
        obs = jax.random.normal(jax.random.fold_in(k_obs, batch),
                                (batch, feature_dim), jnp.float32)
        values = jax.block_until_ready(critic_forward(obs, params))
        ref = critic_reference(obs, params)
        assert values.shape == (batch, 1), values.shape
        # bf16 matmul inputs with f32 accumulation -> relative error ~1e-3;
        # tolerance set accordingly.
        assert jnp.allclose(values, ref, atol=2e-2, rtol=2e-2), (
            batch, float(jnp.max(jnp.abs(values - ref))))

    print("KERNEL_OK")
</pallas_src>

<mosaic_0001>
module attributes {stable_mosaic.version = 11 : i64} {
  func.func @critic_mlp_kernel(%arg0: i32, %arg1: memref<8x16xf32, #tpu.memory_space<vmem>>, %arg2: memref<16x256xbf16, #tpu.memory_space<vmem>>, %arg3: memref<1x256xf32, #tpu.memory_space<vmem>>, %arg4: memref<256x256xbf16, #tpu.memory_space<vmem>>, %arg5: memref<1x256xf32, #tpu.memory_space<vmem>>, %arg6: memref<256x128xbf16, #tpu.memory_space<vmem>>, %arg7: memref<1x128xf32, #tpu.memory_space<vmem>>, %arg8: memref<1x128xf32, #tpu.memory_space<vmem>>, %arg9: memref<1x1xf32, #tpu.memory_space<vmem>>, %arg10: memref<8x1xf32, #tpu.memory_space<vmem>>) attributes {dimension_semantics = [#tpu.dimension_semantics<parallel>], iteration_bounds = array<i64: 1>, scalar_prefetch = 0 : i64, scratch_operands = 0 : i64, tpu.core_type = #tpu.core_type<tc>, window_params = [{transform_indices = @transform_0, window_bounds = array<i64: 8, 16>}, {pipeline_mode = #tpu.pipeline_mode<synchronous>, transform_indices = @transform_1, window_bounds = array<i64: 16, 256>}, {pipeline_mode = #tpu.pipeline_mode<synchronous>, transform_indices = @transform_2, window_bounds = array<i64: 1, 256>}, {pipeline_mode = #tpu.pipeline_mode<synchronous>, transform_indices = @transform_3, window_bounds = array<i64: 256, 256>}, {pipeline_mode = #tpu.pipeline_mode<synchronous>, transform_indices = @transform_4, window_bounds = array<i64: 1, 256>}, {pipeline_mode = #tpu.pipeline_mode<synchronous>, transform_indices = @transform_5, window_bounds = array<i64: 256, 128>}, {pipeline_mode = #tpu.pipeline_mode<synchronous>, transform_indices = @transform_6, window_bounds = array<i64: 1, 128>}, {pipeline_mode = #tpu.pipeline_mode<synchronous>, transform_indices = @transform_7, window_bounds = array<i64: 1, 128>}, {pipeline_mode = #tpu.pipeline_mode<synchronous>, transform_indices = @transform_8, window_bounds = array<i64: 1, 1>}, {transform_indices = @transform_9, window_bounds = array<i64: 8, 1>}]} {
    %c0 = arith.constant 0 : index
    %c0_0 = arith.constant 0 : index
    %0 = vector.load %arg1[%c0, %c0_0] : memref<8x16xf32, #tpu.memory_space<vmem>>, vector<8x16xf32>
    %1 = arith.truncf %0 : vector<8x16xf32> to vector<8x16xbf16>
    %c0_1 = arith.constant 0 : index
    %c0_2 = arith.constant 0 : index
    %2 = vector.load %arg2[%c0_1, %c0_2] : memref<16x256xbf16, #tpu.memory_space<vmem>>, vector<16x256xbf16>
    %cst = arith.constant dense<0.000000e+00> : vector<8x256xf32>
    %3 = tpu.matmul %1, %2, %cst {dimension_numbers = #tpu.dot_dimension_numbers<[1], [0], [0], [1], [0, 0, 1, 1], [], []>} : vector<8x16xbf16>, vector<16x256xbf16>, vector<8x256xf32> -> vector<8x256xf32>
    %c0_3 = arith.constant 0 : index
    %c0_4 = arith.constant 0 : index
    %4 = vector.load %arg3[%c0_3, %c0_4] : memref<1x256xf32, #tpu.memory_space<vmem>>, vector<1x256xf32>
    %5 = vector.broadcast %4 : vector<1x256xf32> to vector<8x256xf32>
    %6 = arith.addf %3, %5 : vector<8x256xf32>
    %cst_5 = arith.constant 0.000000e+00 : f32
    %7 = vector.broadcast %cst_5 : f32 to vector<8x256xf32>
    %8 = arith.maximumf %6, %7 : vector<8x256xf32>
    %9 = arith.truncf %8 : vector<8x256xf32> to vector<8x256xbf16>
    %c0_6 = arith.constant 0 : index
    %c0_7 = arith.constant 0 : index
    %10 = vector.load %arg4[%c0_6, %c0_7] : memref<256x256xbf16, #tpu.memory_space<vmem>>, vector<256x256xbf16>
    %cst_8 = arith.constant dense<0.000000e+00> : vector<8x256xf32>
    %11 = tpu.matmul %9, %10, %cst_8 {dimension_numbers = #tpu.dot_dimension_numbers<[1], [0], [0], [1], [0, 0, 1, 1], [], []>} : vector<8x256xbf16>, vector<256x256xbf16>, vector<8x256xf32> -> vector<8x256xf32>
    %c0_9 = arith.constant 0 : index
    %c0_10 = arith.constant 0 : index
    %12 = vector.load %arg5[%c0_9, %c0_10] : memref<1x256xf32, #tpu.memory_space<vmem>>, vector<1x256xf32>
    %13 = vector.broadcast %12 : vector<1x256xf32> to vector<8x256xf32>
    %14 = arith.addf %11, %13 : vector<8x256xf32>
    %15 = math.tanh %14 : vector<8x256xf32>
    %16 = arith.truncf %15 : vector<8x256xf32> to vector<8x256xbf16>
    %c0_11 = arith.constant 0 : index
    %c0_12 = arith.constant 0 : index
    %17 = vector.load %arg6[%c0_11, %c0_12] : memref<256x128xbf16, #tpu.memory_space<vmem>>, vector<256x128xbf16>
    %cst_13 = arith.constant dense<0.000000e+00> : vector<8x128xf32>
    %18 = tpu.matmul %16, %17, %cst_13 {dimension_numbers = #tpu.dot_dimension_numbers<[1], [0], [0], [1], [0, 0, 1, 1], [], []>} : vector<8x256xbf16>, vector<256x128xbf16>, vector<8x128xf32> -> vector<8x128xf32>
    %c0_14 = arith.constant 0 : index
    %c0_15 = arith.constant 0 : index
    %19 = vector.load %arg7[%c0_14, %c0_15] : memref<1x128xf32, #tpu.memory_space<vmem>>, vector<1x128xf32>
    %20 = vector.broadcast %19 : vector<1x128xf32> to vector<8x128xf32>
    %21 = arith.addf %18, %20 : vector<8x128xf32>
    %22 = math.tanh %21 : vector<8x128xf32>
    %c0_16 = arith.constant 0 : index
    %c0_17 = arith.constant 0 : index
    %23 = vector.load %arg8[%c0_16, %c0_17] : memref<1x128xf32, #tpu.memory_space<vmem>>, vector<1x128xf32>
    %24 = vector.broadcast %23 : vector<1x128xf32> to vector<8x128xf32>
    %25 = arith.mulf %22, %24 : vector<8x128xf32>
    %cst_18 = arith.constant dense<0.000000e+00> : vector<8xf32>
    %26 = vector.multi_reduction <add>, %25, %cst_18 [1] : vector<8x128xf32> to vector<8xf32>
    %27 = vector.shape_cast %26 : vector<8xf32> to vector<8x1xf32>
    %c0_19 = arith.constant 0 : index
    %c0_20 = arith.constant 0 : index
    %28 = vector.load %arg9[%c0_19, %c0_20] : memref<1x1xf32, #tpu.memory_space<vmem>>, vector<1x1xf32>
    %29 = vector.broadcast %28 : vector<1x1xf32> to vector<8x1xf32>
    %30 = arith.addf %27, %29 : vector<8x1xf32>
    %c0_21 = arith.constant 0 : index
    %c0_22 = arith.constant 0 : index
    %31 = vector.load %arg10[%c0_21, %c0_22] : memref<8x1xf32, #tpu.memory_space<vmem>>, vector<8x1xf32>
    tpu.vector_store %arg10[%c0_21, %c0_22], %30 {strides = array<i32>} : memref<8x1xf32, #tpu.memory_space<vmem>>, vector<8x1xf32>,
    return
  }
  func.func @transform_0(%arg0: i32) -> (i32, i32) {
    %c0_i32 = arith.constant 0 : i32
    %c0_i32_0 = arith.constant 0 : i32
    return %arg0, %c0_i32 : i32, i32
  }
  func.func @transform_1(%arg0: i32) -> (i32, i32) {
    %c0_i32 = arith.constant 0 : i32
    %c0_i32_0 = arith.constant 0 : i32
    %c0_i32_1 = arith.constant 0 : i32
    return %c0_i32, %c0_i32_0 : i32, i32
  }
  func.func @transform_2(%arg0: i32) -> (i32, i32) {
    %c0_i32 = arith.constant 0 : i32
    %c0_i32_0 = arith.constant 0 : i32
    %c0_i32_1 = arith.constant 0 : i32
    return %c0_i32, %c0_i32_0 : i32, i32
  }
  func.func @transform_3(%arg0: i32) -> (i32, i32) {
    %c0_i32 = arith.constant 0 : i32
    %c0_i32_0 = arith.constant 0 : i32
    %c0_i32_1 = arith.constant 0 : i32
    return %c0_i32, %c0_i32_0 : i32, i32
  }
  func.func @transform_4(%arg0: i32) -> (i32, i32) {
    %c0_i32 = arith.constant 0 : i32
    %c0_i32_0 = arith.constant 0 : i32
    %c0_i32_1 = arith.constant 0 : i32
    return %c0_i32, %c0_i32_0 : i32, i32
  }
  func.func @transform_5(%arg0: i32) -> (i32, i32) {
    %c0_i32 = arith.constant 0 : i32
    %c0_i32_0 = arith.constant 0 : i32
    %c0_i32_1 = arith.constant 0 : i32
    return %c0_i32, %c0_i32_0 : i32, i32
  }
  func.func @transform_6(%arg0: i32) -> (i32, i32) {
    %c0_i32 = arith.constant 0 : i32
    %c0_i32_0 = arith.constant 0 : i32
    %c0_i32_1 = arith.constant 0 : i32
    return %c0_i32, %c0_i32_0 : i32, i32
  }
  func.func @transform_7(%arg0: i32) -> (i32, i32) {
    %c0_i32 = arith.constant 0 : i32
    %c0_i32_0 = arith.constant 0 : i32
    %c0_i32_1 = arith.constant 0 : i32
    return %c0_i32, %c0_i32_0 : i32, i32
  }
  func.func @transform_8(%arg0: i32) -> (i32, i32) {
    %c0_i32 = arith.constant 0 : i32
    %c0_i32_0 = arith.constant 0 : i32
    %c0_i32_1 = arith.constant 0 : i32
    return %c0_i32, %c0_i32_0 : i32, i32
  }
  func.func @transform_9(%arg0: i32) -> (i32, i32) {
    %c0_i32 = arith.constant 0 : i32
    %c0_i32_0 = arith.constant 0 : i32
    return %arg0, %c0_i32 : i32, i32
  }
}

</mosaic_0001>

<bundles_post_ra>
// kernel: critic_forward.1
= control target key start
LH: loop header
LB: loop body
LE: loop exit
PB: predicated region body
PF: predicated region fallthrough
CT: control target
= control target key end

     0   :  { %v709_v1 = vmov 0   ;;  %vm61_vm0 = vcmask 130048   ;;  %v41_v43 = vlaneseq  ;;  %vm553_vm1 = vcmask 7168   ;;  %s931_s1 = inlined_call_operand.vmem [shape: bf16[16,256], index: 1, kind: input, shape index: {}]   ;;  %s932_s0 = inlined_call_operand.vmem [shape: f32[8,16], index: 0, kind: input, shape index: {}]   ;;  %s933_s3 = inlined_call_operand.vmem [shape: bf16[256,256], index: 3, kind: input, shape index: {}]   ;;  %s934_s5 = inlined_call_operand.vmem [shape: bf16[256,128], index: 5, kind: input, shape index: {}]   ;;  %s935_s2 = inlined_call_operand.vmem [shape: f32[1,256], index: 2, kind: input, shape index: {}]   ;;  %s936_s4 = inlined_call_operand.vmem [shape: f32[1,256], index: 4, kind: input, shape index: {}]   ;;  %s937_s8 = inlined_call_operand.<no memory space> [shape: f32[1,1], index: 8, kind: input, shape index: {}]   ;;  %s938_s6 = inlined_call_operand.vmem [shape: f32[1,128], index: 6, kind: input, shape index: {}]   ;;  %s939_s7 = inlined_call_operand.vmem [shape: f32[1,128], index: 7, kind: input, shape index: {}]   ;;  %s940_s9 = inlined_call_operand.vmem [shape: f32[8,1], index: 9, kind: output, shape index: {}]  }
   0x1   :  { %v636_v0 = vld [vmem:[%s931_s1 + $0x4] ss:$8 sps:$4 sm:$0xff]   ;;  %97 = vmatprep.mubr.bf16.mxu0 %v709_v1  ;;  %v638_v2 = vld [vmem:[%s931_s1] ss:$8 sps:$4 sm:$0xff]   ;;  %v639_v5 = vld [vmem:[%s933_s3 + $0x74] ss:$8 sps:$4 sm:$0xff]  }
   0x2   :  { %v35_v3 = vld [vmem:[%s932_s0] sm:$0xff]  ;;  %79 = vmatprep.subr.bf16.mxu0 %v636_v0  ;;  %v641_v6 = vld [vmem:[%s933_s3 + $0x70] ss:$8 sps:$4 sm:$0xff]   ;;  %314 = vmatprep.subr.bf16.mxu1 %v639_v5  ;;  %v645_v9 = vld [vmem:[%s933_s3 + $0x54] ss:$8 sps:$4 sm:$0xff]   ;;  %v42_v44 = vshrl.u32 %v41_v43, 7 }
   0x3   :  { %v36_v4 = vpack.c.bf16 %v35_v3, %v35_v3  ;;  %80 = vmatpush1.bf16.msra.mxu0 %v638_v2  ;;  %v642_v7 = vld [vmem:[%s933_s3 + $0x64] ss:$8 sps:$4 sm:$0xff]   ;;  %315 = vmatpush1.bf16.msra.mxu1 %v641_v6  ;;  %v644_v8 = vld [vmem:[%s933_s3 + $0x60] ss:$8 sps:$4 sm:$0xff]   ;;  %v647_v10 = vld [vmem:[%s933_s3 + $0x50] ss:$8 sps:$4 sm:$0xff]  }
   0x4   :  { %316 = vmatprep.subr.bf16.mxu1 %v642_v7  ;;  %v648_v11 = vld [vmem:[%s933_s3 + $0x44] ss:$8 sps:$4 sm:$0xff]   ;;  %v650_v12 = vld [vmem:[%s933_s3 + $0x40] ss:$8 sps:$4 sm:$0xff]   ;;  %v651_v13 = vld [vmem:[%s933_s3 + $0x34] ss:$8 sps:$4 sm:$0xff]  }
   0x5   :  { %v653_v14 = vld [vmem:[%s933_s3 + $0x30] ss:$8 sps:$4 sm:$0xff]   ;;  %v654_v15 = vld [vmem:[%s933_s3 + $0x24] ss:$8 sps:$4 sm:$0xff]   ;;  %v656_v16 = vld [vmem:[%s933_s3 + $0x20] ss:$8 sps:$4 sm:$0xff]  }
   0x6   :  { %561 = vmatmul.mubr.msk.bf16.vlgmr.msra.gmra.mxu0 %vm61_vm0, %v36_v4  ;;  %v657_v17 = vld [vmem:[%s933_s3 + $0x14] ss:$8 sps:$4 sm:$0xff]   ;;  %v659_v18 = vld [vmem:[%s933_s3 + $0x10] ss:$8 sps:$4 sm:$0xff]   ;;  %v660_v19 = vld [vmem:[%s933_s3 + $0x4] ss:$8 sps:$4 sm:$0xff]  }
   0x7   :  { %317 = vmatpush1.bf16.msra.mxu1 %v644_v8  ;;  %v662_v20 = vld [vmem:[%s933_s3] ss:$8 sps:$4 sm:$0xff]   ;;  %v663_v21 = vld [vmem:[%s933_s3 + $0xf4] ss:$8 sps:$4 sm:$0xff]   ;;  %v665_v22 = vld [vmem:[%s933_s3 + $0xf0] ss:$8 sps:$4 sm:$0xff]  }
   0x8   :  { %318 = vmatprep.subr.bf16.mxu1 %v645_v9  ;;  %v666_v23 = vld [vmem:[%s933_s3 + $0xe4] ss:$8 sps:$4 sm:$0xff]   ;;  %v668_v24 = vld [vmem:[%s933_s3 + $0xe0] ss:$8 sps:$4 sm:$0xff]   ;;  %v669_v25 = vld [vmem:[%s933_s3 + $0xd4] ss:$8 sps:$4 sm:$0xff]  }
   0x9   :  { %v671_v26 = vld [vmem:[%s933_s3 + $0xd0] ss:$8 sps:$4 sm:$0xff]   ;;  %v672_v27 = vld [vmem:[%s933_s3 + $0xc4] ss:$8 sps:$4 sm:$0xff]   ;;  %v674_v28 = vld [vmem:[%s933_s3 + $0xc0] ss:$8 sps:$4 sm:$0xff]  }
   0xa   :  { %v675_v29 = vld [vmem:[%s933_s3 + $0xb4] ss:$8 sps:$4 sm:$0xff]   ;;  %v677_v30 = vld [vmem:[%s933_s3 + $0xb0] ss:$8 sps:$4 sm:$0xff]   ;;  %v678_v31 = vld [vmem:[%s933_s3 + $0xa4] ss:$8 sps:$4 sm:$0xff]  }
   0xb   :  { %319 = vmatpush1.bf16.msra.mxu1 %v647_v10  ;;  %v680_v32 = vld [vmem:[%s933_s3 + $0xa0] ss:$8 sps:$4 sm:$0xff]   ;;  %v681_v33 = vld [vmem:[%s933_s3 + $0x94] ss:$8 sps:$4 sm:$0xff]   ;;  %v683_v34 = vld [vmem:[%s933_s3 + $0x90] ss:$8 sps:$4 sm:$0xff]  }
   0xc   :  { %320 = vmatprep.subr.bf16.mxu1 %v648_v11  ;;  %v684_v35 = vld [vmem:[%s933_s3 + $0x84] ss:$8 sps:$4 sm:$0xff]   ;;  %v686_v36 = vld [vmem:[%s933_s3 + $0x80] ss:$8 sps:$4 sm:$0xff]   ;;  %v687_v37 = vld [vmem:[%s934_s5 + $0x78] sm:$0xff]   ;;  %v43_v45 = vsub.s32 0, %v42_v44 }
   0xd   :  { %v688_v38 = vld [vmem:[%s934_s5 + $0x38] sm:$0xff]   ;;  %613 = vmatprep.subr.bf16.mxu0 %v687_v37  ;;  %v689_v39 = vld [vmem:[%s934_s5 + $0x70] sm:$0xff]   ;;  %v691_v41 = vld [vmem:[%s934_s5 + $0x68] sm:$0xff]   ;;  %v47_v47 = vsub.s32 1, %v42_v44 }
   0xe   :  { %614 = vmatpush3.bf16.msra.mxu0 %v688_v38  ;;  %v690_v40 = vld [vmem:[%s934_s5 + $0x30] sm:$0xff]   ;;  %v692_v42 = vld [vmem:[%s934_s5 + $0x28] sm:$0xff]   ;;  %v39_v46 = vld [vmem:[%s935_s2] sm:$0x3] }
   0xf   :  { %321 = vmatpush1.bf16.msra.mxu1 %v650_v12  ;;  %615 = vmatprep.subr.bf16.mxu0 %v689_v39  ;;  %v44_v48 = vrot.slane %v39_v46, %v43_v45  ;;  %v48_v49 = vrot.slane %v39_v46, %v47_v47  ;;  %v693_v60 = vld [vmem:[%s934_s5 + $0x60] sm:$0xff]   ;;  %v695_v62 = vld [vmem:[%s934_s5 + $0x58] sm:$0xff]   ;;  %v697_v0 = vld [vmem:[%s934_s5 + $0x50] sm:$0xff]  }
  0x10   :  { %322 = vmatprep.subr.bf16.mxu1 %v651_v13  ;;  %v694_v61 = vld [vmem:[%s934_s5 + $0x20] sm:$0xff]   ;;  %v696_v63 = vld [vmem:[%s934_s5 + $0x18] sm:$0xff]   ;;  %v698_v1 = vld [vmem:[%s934_s5 + $0x10] sm:$0xff]  }
  0x11   :  { %v699_v2 = vld [vmem:[%s934_s5 + $0x48] sm:$0xff]   ;;  %v701_v4 = vld [vmem:[%s934_s5 + $0x40] sm:$0xff]  }
  0x12   :  { %616 = vmatpush3.bf16.msra.mxu0 %v690_v40  ;;  %v700_v3 = vld [vmem:[%s934_s5 + $0x8] sm:$0xff]   ;;  %v702_v5 = vld [vmem:[%s934_s5] sm:$0xff]  }
  0x13   :  { %323 = vmatpush1.bf16.msra.mxu1 %v653_v14  ;;  %617 = vmatprep.subr.bf16.mxu0 %v691_v41  ;;  %v142_v6 = vld [vmem:[%s936_s4] sm:$0x3] }
  0x14   :  { %324 = vmatprep.subr.bf16.mxu1 %v654_v15  ;;  %v147_v7 = vrot.slane %v142_v6, %v43_v45  ;;  %v151_v8 = vrot.slane %v142_v6, %v47_v47 }
  0x16   :  { %618 = vmatpush3.bf16.msra.mxu0 %v692_v42 }
  0x17   :  { %325 = vmatpush1.bf16.msra.mxu1 %v656_v16  ;;  %619 = vmatprep.subr.bf16.mxu0 %v693_v60 }
  0x18   :  { %326 = vmatprep.subr.bf16.mxu1 %v657_v17 }
  0x1a   :  { %620 = vmatpush3.bf16.msra.mxu0 %v694_v61 }
  0x1b   :  { %327 = vmatpush1.bf16.msra.mxu1 %v659_v18  ;;  %621 = vmatprep.subr.bf16.mxu0 %v695_v62 }
  0x1c   :  { %328 = vmatprep.subr.bf16.mxu1 %v660_v19  ;;  %v14_v19 = vstv %s937_s8 }
  0x1d   :  { %15 = vst [vmem:[#allocation2] sm:$0x1] %v14_v19 }
  0x1e   :  { %622 = vmatpush3.bf16.msra.mxu0 %v696_v63 }
  0x1f   :  { %329 = vmatpush1.bf16.msra.mxu1 %v662_v20  ;;  %623 = vmatprep.subr.bf16.mxu0 %v697_v0 }
  0x20   :  { %330 = vmatprep.subr.bf16.mxu1 %v663_v21  ;;  %v594_v21 = vld [vmem:[%s938_s6] ss:$0 sm:$0xff] }
  0x22   :  { %624 = vmatpush3.bf16.msra.mxu0 %v698_v1 }
  0x23   :  { %331 = vmatpush2.bf16.msra.mxu1 %v665_v22  ;;  %625 = vmatprep.subr.bf16.mxu0 %v699_v2 }
  0x24   :  { %332 = vmatprep.subr.bf16.mxu1 %v666_v23 }
  0x26   :  { %626 = vmatpush3.bf16.msra.mxu0 %v700_v3 }
  0x27   :  { %333 = vmatpush2.bf16.msra.mxu1 %v668_v24  ;;  %627 = vmatprep.subr.bf16.mxu0 %v701_v4 }
  0x28   :  { %334 = vmatprep.subr.bf16.mxu1 %v669_v25 }
  0x2a   :  { %628 = vmatpush3.bf16.msra.mxu0 %v702_v5 }
  0x2b   :  { %335 = vmatpush2.bf16.msra.mxu1 %v671_v26 }
  0x2c   :  { %336 = vmatprep.subr.bf16.mxu1 %v672_v27  ;;  %v611_v27 = vld [vmem:[%s939_s7] ss:$0 sm:$0xff] }
  0x2f   :  { %337 = vmatpush2.bf16.msra.mxu1 %v674_v28 }
  0x30   :  { %338 = vmatprep.subr.bf16.mxu1 %v675_v29 }
  0x33   :  { %339 = vmatpush2.bf16.msra.mxu1 %v677_v30  ;;  %v612_v30 = vld [vmem:[#allocation2] ss:$0 sm:$0xff] }
  0x34   :  { %340 = vmatprep.subr.bf16.mxu1 %v678_v31 }
  0x37   :  { %341 = vmatpush2.bf16.msra.mxu1 %v680_v32 }
  0x38   :  { %342 = vmatprep.subr.bf16.mxu1 %v681_v33 }
  0x3b   :  { %343 = vmatpush2.bf16.msra.mxu1 %v683_v34 }
  0x3c   :  { %344 = vmatprep.subr.bf16.mxu1 %v684_v35 }
  0x3f   :  { %345 = vmatpush2.bf16.msra.mxu1 %v686_v36 }
  0xc6   :  { %v99_v50 = vpop.f32.mrf.mxu0 }
  0xc7   :  { %v100_v51 = vadd.f32 %v99_v50, %v44_v48 }
  0xc8   :  { %v101_v52 = vpop.f32.mrf.mxu0 }
  0xc9   :  { %v102_v53 = vadd.f32 %v101_v52, %v48_v49  ;;  %v106_v54 = vmax.f32 %v100_v51, 0.0 }
  0xca   :  { %v103_v55 = vpop.f32.mrf.mxu0 }
  0xcb   :  { %v107_v56 = vmax.f32 %v102_v53, 0.0  ;;  %v108_v59 = vpack.c.bf16 %v106_v54, %v106_v54 }
  0xcc   :  { %v104_v57 = vpop.f32.mrf.mxu0 }
  0xcd   :  { %v109_v58 = vpack.c.bf16 %v107_v56, %v107_v56 }
  0xcf   :  { %346 = vmatprep.mubr.bf16.mxu1 %v109_v58 }
  0xd0   :  { %347 = vmatmul.mubr.bf16.vlgmr.msra.gmra.mxu1 %v108_v59 }
 0x190   :  { %v348_v9 = vpop.f32.mrf.mxu1 }
 0x191   :  { %v349_v10 = vadd.f32 %v348_v9, %v147_v7 }
 0x192   :  { %v350_v11 = vpop.f32.mrf.mxu1 }
 0x193   :  { %v351_v12 = vadd.f32 %v350_v11, %v151_v8  ;;  %703 = vtanh.f32 %v349_v10 }
 0x194   :  { %v352_v13 = vpop.f32.mrf.mxu1 }
 0x195   :  { %705 = vtanh.f32 %v351_v12 }
 0x196   :  { %v353_v14 = vpop.f32.mrf.mxu1 }
 0x1a0   :  { %v704_v15 = vpop.eup %703 }
 0x1a1   :  { %v357_v18 = vpack.c.bf16 %v704_v15, %v704_v15 }
 0x1a2   :  { %v706_v16 = vpop.eup %705 }
 0x1a3   :  { %v358_v17 = vpack.c.bf16 %v706_v16, %v706_v16 }
 0x1a5   :  { %526 = vmatprep.mubr.bf16.mxu0 %v358_v17 }
 0x1a6   :  { %527 = vmatmul.mubr.bf16.vlgmr.msra.gmra.mxu0 %v357_v18 }
 0x266   :  { %v629_v20 = vpop.f32.mrf.mxu0 }
 0x268   :  { %v630_v22 = vpop.f32.mrf.mxu0 }
 0x269   :  { %v631_v23 = vadd.f32 %v630_v22, %v629_v20 }
 0x26a   :  { %v632_v24 = vpop.f32.mrf.mxu0 }
 0x26b   :  { %v529_v25 = vadd.f32 %v631_v23, %v594_v21 }
 0x26c   :  { %v633_v26 = vpop.f32.mrf.mxu0 }
 0x26d   :  { %707 = vtanh.f32 %v529_v25 }
 0x27a   :  { %v708_v28 = vpop.eup %707 }
 0x27b   :  { %v542_v29 = vmul.f32 %v708_v28, %v611_v27 }
 0x27d   :  { %543 = vadd.xlane.f32.xlu0 %v542_v29 }
 0x306   :  { %v544_v31 = vpop.xlane.xlu0 %543 }
 0x307   :  { %v552_v32 = vadd.f32 %v612_v30, %v544_v31 }
 0x309   :  { %554 = vst.msk [vmem:[%s940_s9] sm:$0xff] %vm553_vm1, %v552_v32 }

</bundles_post_ra>
